<compile_context>
chip_gen: v6e
topology: v6e:2x2x1
jax: 0.10.0
libtpu: 0.0.40
codegen_flags: <defaults>
</compile_context>

<pallas_src>
import functools

import jax
import jax.numpy as jnp
from jax.experimental import pallas as pl
from jax.experimental.pallas import tpu as pltpu


# ---------------------------------------------------------------------------
# Resident-table path: table lives in VMEM, gather = one-hot MXU matmul.
# ---------------------------------------------------------------------------

def _resident_ce_kernel(idx_ref, tgt_ref, emb_ref, logits_ref, nllsum_ref, *,
                        n_valid):
    """One grid step = G token rows: fused embedding gather + cross-entropy."""
    G, V = logits_ref.shape
    col = jax.lax.broadcasted_iota(jnp.int32, (G, V), 1)          # lane ids

    # One-hot gather on the MXU: (G, V) @ (V, V) -> (G, V).
    onehot = (idx_ref[...] == col).astype(emb_ref.dtype)
    logits = jnp.dot(onehot, emb_ref[...],
                     preferred_element_type=jnp.float32)
    logits_ref[...] = logits.astype(logits_ref.dtype)

    # Numerically stable log-sum-exp per row.
    m = jnp.max(logits, axis=-1, keepdims=True)                    # (G, 1)
    lse = m + jnp.log(jnp.sum(jnp.exp(logits - m), axis=-1, keepdims=True))

    # logits[target] per row via one vectorized compare/select per block.
    picked = jnp.sum(jnp.where(tgt_ref[...] == col, logits, 0.0),
                     axis=-1, keepdims=True)                       # (G, 1)
    nll = lse - picked

    # Zero out padded rows (global row id >= n_valid).
    rows = pl.program_id(0) * G + jax.lax.broadcasted_iota(jnp.int32, (G, 1), 0)
    nll = jnp.where(rows < n_valid, nll, 0.0)

    # Per-block partial sum of the NLL; O(N/G) final reduce happens outside.
    nllsum_ref[...] = jnp.sum(nll).reshape(1, 1, 1)


def _resident_gather_kernel(idx_ref, emb_ref, logits_ref):
    """Inference path: one-hot MXU gather only, no cross-entropy math."""
    G, V = logits_ref.shape
    col = jax.lax.broadcasted_iota(jnp.int32, (G, V), 1)
    onehot = (idx_ref[...] == col).astype(emb_ref.dtype)
    logits_ref[...] = jnp.dot(onehot, emb_ref[...],
                              preferred_element_type=jnp.float32
                              ).astype(logits_ref.dtype)


def _pick_block_rows(n):
    """Largest G (multiple of 8) such that the grid still has >= 2 steps."""
    for g in (512, 256, 128, 64, 32, 16, 8):
        if n >= 2 * g:
            return g
    return 8


@functools.partial(jax.jit, static_argnames=("n_valid", "block_g"))
def _resident_logits_and_loss(idx2d, tgt2d, emb_table, *, n_valid, block_g):
    n_pad = idx2d.shape[0]
    V = emb_table.shape[1]
    nb = n_pad // block_g
    cost = pl.CostEstimate(
        flops=2 * n_pad * V * V + 6 * n_pad * V,
        transcendentals=n_pad * (V + 1),
        bytes_accessed=V * V * 4 + 8 * n_pad + 4 * n_pad * V + 4 * nb,
    )
    logits, nll_part = pl.pallas_call(
        functools.partial(_resident_ce_kernel, n_valid=n_valid),
        out_shape=(jax.ShapeDtypeStruct((n_pad, V), jnp.float32),
                   jax.ShapeDtypeStruct((nb, 1, 1), jnp.float32)),
        grid_spec=pltpu.PrefetchScalarGridSpec(
            num_scalar_prefetch=0,
            grid=(nb,),
            in_specs=[
                pl.BlockSpec((block_g, 1), lambda i: (i, 0)),   # idx  (lane-dense VMEM)
                pl.BlockSpec((block_g, 1), lambda i: (i, 0)),   # targets
                pl.BlockSpec((V, V), lambda i: (0, 0)),         # table: resident all steps
            ],
            out_specs=(
                pl.BlockSpec((block_g, V), lambda i: (i, 0)),   # full-tile logits stores
                pl.BlockSpec((1, 1, 1), lambda i: (i, 0, 0)),   # per-block NLL partial sum
            ),
        ),
        compiler_params=pltpu.CompilerParams(
            dimension_semantics=("parallel",),      # row blocks independent -> megacore
            vmem_limit_bytes=32 * 1024 * 1024,      # safe on v5e/v6e/v7x
        ),
        cost_estimate=cost,
    )(idx2d, tgt2d, emb_table)
    loss = jnp.sum(nll_part) / n_valid
    return logits[:n_valid], loss


@functools.partial(jax.jit, static_argnames=("n_valid", "block_g"))
def _resident_logits_only(idx2d, emb_table, *, n_valid, block_g):
    n_pad = idx2d.shape[0]
    V = emb_table.shape[1]
    nb = n_pad // block_g
    cost = pl.CostEstimate(
        flops=2 * n_pad * V * V,
        transcendentals=0,
        bytes_accessed=V * V * 4 + 4 * n_pad + 4 * n_pad * V,
    )
    logits = pl.pallas_call(
        _resident_gather_kernel,
        out_shape=jax.ShapeDtypeStruct((n_pad, V), jnp.float32),
        grid_spec=pltpu.PrefetchScalarGridSpec(
            num_scalar_prefetch=0,
            grid=(nb,),
            in_specs=[
                pl.BlockSpec((block_g, 1), lambda i: (i, 0)),
                pl.BlockSpec((V, V), lambda i: (0, 0)),
            ],
            out_specs=pl.BlockSpec((block_g, V), lambda i: (i, 0)),
        ),
        compiler_params=pltpu.CompilerParams(
            dimension_semantics=("parallel",),
            vmem_limit_bytes=32 * 1024 * 1024,
        ),
        cost_estimate=cost,
    )(idx2d, emb_table)
    return logits[:n_valid]


# ---------------------------------------------------------------------------
# Large-vocab fallback: per-row DMA gather (table does not fit VMEM).
# ---------------------------------------------------------------------------
# TODO(synk): for very large V, replace the per-row Element gather with a
# manual batched gather (memory_space=pl.ANY + ring of make_async_copy) so
# many row DMAs stay in flight per block.

def _dma_gather_ce_kernel(idx_sref, tgt_sref, emb_row_ref, logits_ref, nll_ref):
    V = logits_ref.shape[-1]
    i = pl.program_id(0)
    row = emb_row_ref[...].reshape(1, V).astype(jnp.float32)
    logits_ref[...] = row.reshape(1, 1, V)
    m = jnp.max(row, axis=-1, keepdims=True)
    lse = m + jnp.log(jnp.sum(jnp.exp(row - m), axis=-1, keepdims=True))
    t = tgt_sref[i]
    col = jax.lax.broadcasted_iota(jnp.int32, (1, V), 1)
    picked = jnp.sum(jnp.where(col == t, row, 0.0), axis=-1, keepdims=True)
    nll_ref[...] = (lse - picked).reshape(1, 1, 1)


def _dma_gather_kernel(idx_sref, emb_row_ref, logits_ref):
    V = logits_ref.shape[-1]
    logits_ref[...] = emb_row_ref[...].reshape(1, 1, V).astype(jnp.float32)


@jax.jit
def _dma_logits_and_nll(idx_flat, tgt_flat, emb_table):
    N = idx_flat.shape[0]
    V = emb_table.shape[1]
    logits, nll = pl.pallas_call(
        _dma_gather_ce_kernel,
        out_shape=(jax.ShapeDtypeStruct((N, 1, V), jnp.float32),
                   jax.ShapeDtypeStruct((N, 1, 1), jnp.float32)),
        grid_spec=pltpu.PrefetchScalarGridSpec(
            num_scalar_prefetch=2,
            grid=(N,),
            in_specs=[
                pl.BlockSpec((pl.Element(1), V),
                             lambda i, idx_ref, tgt_ref: (idx_ref[i], 0),
                             pipeline_mode=pl.Buffered(4)),   # more gather DMAs in flight
            ],
            out_specs=(
                pl.BlockSpec((1, 1, V), lambda i, idx_ref, tgt_ref: (i, 0, 0)),
                pl.BlockSpec((1, 1, 1), lambda i, idx_ref, tgt_ref: (i, 0, 0)),
            ),
        ),
        compiler_params=pltpu.CompilerParams(dimension_semantics=("parallel",)),
    )(idx_flat, tgt_flat, emb_table)
    return logits[:, 0, :], nll[:, 0, 0]


@jax.jit
def _dma_logits_only(idx_flat, emb_table):
    N = idx_flat.shape[0]
    V = emb_table.shape[1]
    logits = pl.pallas_call(
        _dma_gather_kernel,
        out_shape=jax.ShapeDtypeStruct((N, 1, V), jnp.float32),
        grid_spec=pltpu.PrefetchScalarGridSpec(
            num_scalar_prefetch=1,
            grid=(N,),
            in_specs=[
                pl.BlockSpec((pl.Element(1), V),
                             lambda i, idx_ref: (idx_ref[i], 0),
                             pipeline_mode=pl.Buffered(4)),
            ],
            out_specs=pl.BlockSpec((1, 1, V), lambda i, idx_ref: (i, 0, 0)),
        ),
        compiler_params=pltpu.CompilerParams(dimension_semantics=("parallel",)),
    )(idx_flat, emb_table)
    return logits[:, 0, :]


# ---------------------------------------------------------------------------
# Wrapper matching Baseline.forward(idx, targets).
# ---------------------------------------------------------------------------

# Conservative: 2x table (double buffer) + (G,V) blocks must fit v7x's
# 64 MiB-physical / 32 MiB-scoped VMEM. v5e/v6e have 128 MiB but we keep one
# threshold that is safe everywhere.
_RESIDENT_TABLE_BYTES_LIMIT = 12 * 1024 * 1024


def baseline_forward(idx, emb_table, targets=None):
    """Pallas equivalent of Baseline.forward(idx, targets)."""
    B, T = idx.shape
    V = emb_table.shape[1]
    N = B * T
    idx_flat = idx.reshape(N).astype(jnp.int32)

    table_bytes = V * V * emb_table.dtype.itemsize
    use_resident = table_bytes <= _RESIDENT_TABLE_BYTES_LIMIT

    if use_resident:
        G = _pick_block_rows(N)
        n_pad = ((N + G - 1) // G) * G
        idx2d = jnp.pad(idx_flat, (0, n_pad - N)).reshape(n_pad, 1)
        if targets is None:
            logits_flat = _resident_logits_only(idx2d, emb_table,
                                                n_valid=N, block_g=G)
            return logits_flat.reshape(B, T, V), None
        tgt2d = jnp.pad(targets.reshape(N).astype(jnp.int32),
                        (0, n_pad - N)).reshape(n_pad, 1)
        logits_flat, loss = _resident_logits_and_loss(idx2d, tgt2d, emb_table,
                                                      n_valid=N, block_g=G)
        return logits_flat.reshape(B, T, V), loss

    # Large-vocab fallback: per-row DMA gather.
    if targets is None:
        logits_flat = _dma_logits_only(idx_flat, emb_table)
        return logits_flat.reshape(B, T, V), None
    tgt_flat = targets.reshape(N).astype(jnp.int32)
    logits_flat, nll = _dma_logits_and_nll(idx_flat, tgt_flat, emb_table)
    return logits_flat.reshape(B, T, V), jnp.mean(nll)


# TODO(synk): Baseline.generate (autoregressive torch.multinomial sampling
# loop) is host-side control flow around forward(); not implemented as a kernel.


if __name__ == "__main__":
    # Small, deterministic setup consistent with Baseline(vocab_size=V).
    V = 128   # vocab_size (embedding table is (V, V), lane-aligned)
    B, T = 2, 8

    key = jax.random.PRNGKey(0)
    k_idx, k_tgt, k_emb = jax.random.split(key, 3)
    idx = jax.random.randint(k_idx, (B, T), 0, V, dtype=jnp.int32)
    targets = jax.random.randint(k_tgt, (B, T), 0, V, dtype=jnp.int32)
    # nn.Embedding default init: N(0, 1)
    emb_table = jax.random.normal(k_emb, (V, V), dtype=jnp.float32)

    # Run kernels (with targets -> loss, and without -> loss is None).
    logits, loss = baseline_forward(idx, emb_table, targets)
    logits_only, loss_none = baseline_forward(idx, emb_table, None)
    jax.block_until_ready(logits)
    jax.block_until_ready(loss)
    jax.block_until_ready(logits_only)
    assert loss_none is None

    # Pure-JAX reference check.
    ref_logits = emb_table[idx]                                   # (B, T, V)
    ref_ls = jax.nn.log_softmax(ref_logits.reshape(-1, V), axis=-1)
    ref_loss = -jnp.mean(ref_ls[jnp.arange(B * T), targets.reshape(-1)])
    assert jnp.allclose(logits, ref_logits, atol=1e-5, rtol=1e-5)
    assert jnp.allclose(logits_only, ref_logits, atol=1e-5, rtol=1e-5)
    assert jnp.allclose(loss, ref_loss, atol=1e-4, rtol=1e-4)

    print("KERNEL_OK")
</pallas_src>

<mosaic_0001>
module attributes {stable_mosaic.version = 11 : i64} {
  func.func @_resident_ce_kernel(%arg0: i32, %arg1: memref<8x1xi32, #tpu.memory_space<vmem>>, %arg2: memref<8x1xi32, #tpu.memory_space<vmem>>, %arg3: memref<128x128xf32, #tpu.memory_space<vmem>>, %arg4: memref<8x128xf32, #tpu.memory_space<vmem>>, %arg5: memref<1x1x1xf32, #tpu.memory_space<vmem>>) attributes {dimension_semantics = [#tpu.dimension_semantics<parallel>], iteration_bounds = array<i64: 2>, scalar_prefetch = 0 : i64, scratch_operands = 0 : i64, tpu.core_type = #tpu.core_type<tc>, window_params = [{transform_indices = @transform_0, window_bounds = array<i64: 8, 1>}, {transform_indices = @transform_1, window_bounds = array<i64: 8, 1>}, {pipeline_mode = #tpu.pipeline_mode<synchronous>, transform_indices = @transform_2, window_bounds = array<i64: 128, 128>}, {transform_indices = @transform_3, window_bounds = array<i64: 8, 128>}, {transform_indices = @transform_4, window_bounds = array<i64: 1, 1, 1>}]} {
    %0 = tpu.iota {dimensions = array<i32: 1>} : vector<8x128xi32>
    %c0 = arith.constant 0 : index
    %c0_0 = arith.constant 0 : index
    %1 = vector.load %arg1[%c0, %c0_0] : memref<8x1xi32, #tpu.memory_space<vmem>>, vector<8x1xi32>
    %2 = vector.broadcast %1 : vector<8x1xi32> to vector<8x128xi32>
    %3 = arith.cmpi eq, %2, %0 : vector<8x128xi32>
    %4 = arith.extui %3 : vector<8x128xi1> to vector<8x128xi32>
    %5 = arith.sitofp %4 : vector<8x128xi32> to vector<8x128xf32>
    %c0_1 = arith.constant 0 : index
    %c0_2 = arith.constant 0 : index
    %6 = vector.load %arg3[%c0_1, %c0_2] : memref<128x128xf32, #tpu.memory_space<vmem>>, vector<128x128xf32>
    %cst = arith.constant dense<0.000000e+00> : vector<8x128xf32>
    %7 = tpu.matmul %5, %6, %cst {dimension_numbers = #tpu.dot_dimension_numbers<[1], [0], [0], [1], [0, 0, 1, 1], [], []>} : vector<8x128xf32>, vector<128x128xf32>, vector<8x128xf32> -> vector<8x128xf32>
    %c0_3 = arith.constant 0 : index
    %c0_4 = arith.constant 0 : index
    %8 = vector.load %arg4[%c0_3, %c0_4] : memref<8x128xf32, #tpu.memory_space<vmem>>, vector<8x128xf32>
    tpu.vector_store %arg4[%c0_3, %c0_4], %7 {strides = array<i32>} : memref<8x128xf32, #tpu.memory_space<vmem>>, vector<8x128xf32>,
    %cst_5 = arith.constant dense<0xFF800000> : vector<8xf32>
    %9 = vector.multi_reduction <maximumf>, %7, %cst_5 [1] : vector<8x128xf32> to vector<8xf32>
    %10 = vector.shape_cast %9 : vector<8xf32> to vector<8x1xf32>
    %11 = vector.broadcast %10 : vector<8x1xf32> to vector<8x128xf32>
    %12 = arith.subf %7, %11 : vector<8x128xf32>
    %13 = math.exp %12 : vector<8x128xf32>
    %cst_6 = arith.constant dense<0.000000e+00> : vector<8xf32>
    %14 = vector.multi_reduction <add>, %13, %cst_6 [1] : vector<8x128xf32> to vector<8xf32>
    %15 = vector.shape_cast %14 : vector<8xf32> to vector<8x1xf32>
    %16 = math.log %15 : vector<8x1xf32>
    %17 = arith.addf %10, %16 : vector<8x1xf32>
    %c0_7 = arith.constant 0 : index
    %c0_8 = arith.constant 0 : index
    %18 = vector.load %arg2[%c0_7, %c0_8] : memref<8x1xi32, #tpu.memory_space<vmem>>, vector<8x1xi32>
    %19 = vector.broadcast %18 : vector<8x1xi32> to vector<8x128xi32>
    %20 = arith.cmpi eq, %19, %0 : vector<8x128xi32>
    %cst_9 = arith.constant 0.000000e+00 : f32
    %21 = vector.broadcast %cst_9 : f32 to vector<8x128xf32>
    %22 = arith.select %20, %7, %21 : vector<8x128xi1>, vector<8x128xf32>
    %cst_10 = arith.constant dense<0.000000e+00> : vector<8xf32>
    %23 = vector.multi_reduction <add>, %22, %cst_10 [1] : vector<8x128xf32> to vector<8xf32>
    %24 = vector.shape_cast %23 : vector<8xf32> to vector<8x1xf32>
    %25 = arith.subf %17, %24 : vector<8x1xf32>
    %c8_i32 = arith.constant 8 : i32
    %26 = arith.muli %arg0, %c8_i32 : i32
    %27 = tpu.iota {dimensions = array<i32: 0>} : vector<8x1xi32>
    %28 = vector.broadcast %26 : i32 to vector<8x1xi32>
    %29 = arith.addi %28, %27 : vector<8x1xi32>
    %c16_i32 = arith.constant 16 : i32
    %30 = vector.broadcast %c16_i32 : i32 to vector<8x1xi32>
    %31 = arith.cmpi slt, %29, %30 : vector<8x1xi32>
    %cst_11 = arith.constant 0.000000e+00 : f32
    %32 = vector.broadcast %cst_11 : f32 to vector<8x1xf32>
    %33 = arith.select %31, %25, %32 : vector<8x1xi1>, vector<8x1xf32>
    %34 = vector.shape_cast %33 : vector<8x1xf32> to vector<1x8x1xf32>
    %cst_12 = arith.constant dense<0.000000e+00> : vector<1xf32>
    %35 = vector.multi_reduction <add>, %34, %cst_12 [1, 2] : vector<1x8x1xf32> to vector<1xf32>
    %36 = vector.shape_cast %35 : vector<1xf32> to vector<1x1x1xf32>
    %37 = vector.extract %36[0, 0, 0] : f32 from vector<1x1x1xf32>
    %38 = vector.broadcast %37 : f32 to vector<1x1x1xf32>
    %c0_13 = arith.constant 0 : index
    %c0_14 = arith.constant 0 : index
    %c0_15 = arith.constant 0 : index
    %39 = vector.load %arg5[%c0_13, %c0_14, %c0_15] : memref<1x1x1xf32, #tpu.memory_space<vmem>>, vector<1x1x1xf32>
    tpu.vector_store %arg5[%c0_13, %c0_14, %c0_15], %38 {strides = array<i32>} : memref<1x1x1xf32, #tpu.memory_space<vmem>>, vector<1x1x1xf32>,
    return
  }
  func.func @transform_0(%arg0: i32) -> (i32, i32) {
    %c0_i32 = arith.constant 0 : i32
    %c0_i32_0 = arith.constant 0 : i32
    return %arg0, %c0_i32 : i32, i32
  }
  func.func @transform_1(%arg0: i32) -> (i32, i32) {
    %c0_i32 = arith.constant 0 : i32
    %c0_i32_0 = arith.constant 0 : i32
    return %arg0, %c0_i32 : i32, i32
  }
  func.func @transform_2(%arg0: i32) -> (i32, i32) {
    %c0_i32 = arith.constant 0 : i32
    %c0_i32_0 = arith.constant 0 : i32
    %c0_i32_1 = arith.constant 0 : i32
    return %c0_i32, %c0_i32_0 : i32, i32
  }
  func.func @transform_3(%arg0: i32) -> (i32, i32) {
    %c0_i32 = arith.constant 0 : i32
    %c0_i32_0 = arith.constant 0 : i32
    return %arg0, %c0_i32 : i32, i32
  }
  func.func @transform_4(%arg0: i32) -> (i32, i32, i32) {
    %c0_i32 = arith.constant 0 : i32
    %c0_i32_0 = arith.constant 0 : i32
    %c0_i32_1 = arith.constant 0 : i32
    return %arg0, %c0_i32, %c0_i32_0 : i32, i32, i32
  }
}

</mosaic_0001>

<bundles_post_ra>
// kernel: _resident_logits_and_loss.1
= control target key start
LH: loop header
LB: loop body
LE: loop exit
PB: predicated region body
PF: predicated region fallthrough
CT: control target
= control target key end

     0   :  { %10 = vsyncpa [#allocation3], 0  ;;  %s872_s0 = inlined_call_operand.vmem [shape: s32[16,1], index: 0, kind: input, shape index: {}]   ;;  %s873_s1 = inlined_call_operand.vmem [shape: s32[16,1], index: 1, kind: input, shape index: {}]   ;;  %s874_s2 = inlined_call_operand.hbm [shape: f32[128,128], index: 2, kind: input, shape index: {}]   ;;  %s875_s3 = inlined_call_operand.hbm [shape: f32[16,128], index: 3, kind: output, shape index: {0}]   ;;  %s876_s4 = inlined_call_operand.vmem [shape: f32[2,1,1], index: 4, kind: output, shape index: {1}]  }
   0x1   :  { %11 = vsyncpa [#allocation4], 0 }
   0x2   :  { %13 = vsyncpa [#allocation4 + $0x1], 0  ;;  %s749_s15 = smov 0   ;;  %s751_s16 = smov 0  }
   0x3   :  { %s753_s17 = smov 0   ;;  %s755_s18 = smov 0  }
   0x4 LB: > { %s770_s19 = sadd.s32 4294967295, %s714_s18   ;;  %s492_s20 = sadd.s32 4294967294, %s714_s18   ;;  %s714_s18 = sphi %s755_s18, %s884_s18   ;;  %s710_s17 = sphi %s753_s17, %s883_s17   ;;  %s706_s16 = sphi %s751_s16, %s882_s16   ;;  %s702_s15 = sphi %s749_s15, %s881_s15  }
   0x5   : > { %s774_s21 = sadd.s32 1, %s714_s18   ;;  %s99_s22 = sadd.s32 1, %s710_s17 }
   0x6   : > { %s96_s23 = ssub.s32 %s714_s18, %s774_s21  ;;  %p109_p0 = scmp.ne.s32.totalorder %s710_s17, %s706_s16 }
   0x7   : > { %p97_p1 = scmp.eq.s32.totalorder %s96_s23, 0  ;;  %p110_p2 = scmp.eq.s32.totalorder %s770_s19, 1 }
   0x8   : > { %p115_p3 = scmp.ne.s32.totalorder %s706_s16, %s702_s15  ;;  %p116_p4 = scmp.eq.s32.totalorder %s492_s20, 1 }
   0x9   : > { %s785_s24 = scalar_select %p97_p1, %s710_s17, %s99_s22  }
   0xa   : > { %p787_p5 = por %p110_p2, %p109_p0  ;;  %p791_p6 = por %p116_p4, %p115_p3 }
   0xb   : > { %p493_p7 = scmp.ge.s32.totalorder %s714_s18, 1  ;;  %p149_p8 = scmp.lt.s32.totalorder %s714_s18, 3 }
   0xc   : > { %s878_s26 = scalar_select %p791_p6, 1, 0 }
   0xd   : > { %p576_p9 = scmp.eq.s32.totalorder %s770_s19, 0  ;;  %p798_p10 = pnand %p493_p7, %p149_p8 }
   0xe   : > { %s716_s28 = smov [#allocation2]  }
   0xf   : > { %s161_s29 = sshll.u32 %s716_s28, 4  ;;  %p568_p11 = pneg %p798_p10  ;;  %s162_s29 = int_to_ptr.vmem [resolvable:$true] %s161_s29 }
  0x10   : > { %s635_s30 = scalar_lea.vmem %s162_s29, 2048  ;;  %p643_p3 = scmp.lt.s32.totalorder %s162_s29, %s162_s29 }
  0x11   : > { %p569_p12 = pnand %p576_p9, %p568_p11  ;;  %p636_p0 = scmp.ne.s32.totalorder %s162_s29, %s635_s30 }
  0x12   : > { %p644_p4 = scmp.lt.s32.totalorder %s635_s30, %s635_s30 }
  0x13   : > { %p626_p13 = pneg %p569_p12 }
  0x14   : > { %p645_p6 = por %p644_p4, %p643_p3 }
  0x15   : > { %p638_p1 = pnand %p636_p0, %p626_p13 }
  0x17   : > { %p639_p2 = pneg %p638_p1 }
  0x19   : > { %p646_p7 = pnand %p645_p6, %p639_p2 }
  0x1b   : > { %649 = shalt.err (!%p646_p7)
}
  0x1c   : > { %s717_s5 = smov 128   ;;  %s718_s6 = smov 8  }
  0x1d   : > { %571 = dma.hbm_to_vmem [thread:$0]  (!%p569_p12), %s874_s2, 2048, %s162_s29, [#allocation3], %s717_s5, %s717_s5, %s718_s6  }
  0x1e   : > { %191 = sbr.rel (%p798_p10) target bundleno = 879 (0x36f), region = 32 }
  0x23   : > { %693 = dma.done.wait (%p576_p9), [#allocation3], 2048  }
  0x24   : > { %695 = vsyncadd (%p576_p9), [#allocation3], 4294965248  ;;  %p223_p8 = scmp.lt.s32.totalorder %s770_s19, 1  ;;  %v719_v0 = vmov 0   ;;  %v720_v1 = vmov 0.0   ;;  %vm721_vm0 = vmmov 0   ;;  %v234_v20 = vlaneseq }
  0x25   : > { %618 = vset.pattern.permute.xlu0 %v719_v0  ;;  %525 = vmatprep.subr.mxu0 %v720_v1  ;;  %v258_v3 = vld [vmem:[#allocation2 + $0x78] sm:$0xff]  ;;  %v257_v4 = vld [vmem:[#allocation2 + $0x70] sm:$0xff]  ;;  %v256_v5 = vld [vmem:[#allocation2 + $0x68] sm:$0xff]  ;;  %v722_v23 = vmov 1.0   ;;  %s215_s23 = sand.u32 1, %s706_s16   ;;  %s503_s29 = sshll.u32 %s770_s19, 3 }
  0x26   : > { %s817_s9 = scalar_select %p223_p8, %s770_s19, 1  ;;  %619 = vset.pattern.permute.xlu1 %v719_v0  ;;  %557 = vmatprep.mubr.msk.f32.mxu0 %vm721_vm0, %v720_v1  ;;  %v255_v6 = vld [vmem:[#allocation2 + $0x60] sm:$0xff]  ;;  %v254_v8 = vld [vmem:[#allocation2 + $0x58] sm:$0xff]  ;;  %v253_v9 = vld [vmem:[#allocation2 + $0x50] sm:$0xff]  ;;  %v235_v21 = vand.u32 127, %v234_v20  ;;  %v351_v33 = vshrl.u32 %v234_v20, 7  ;;  %v352_v34 = vstv %s503_s29 }
  0x27   : > { %526 = vmatpush3.msra.mxu0 %v258_v3  ;;  %v252_v10 = vld [vmem:[#allocation2 + $0x48] sm:$0xff]  ;;  %v251_v11 = vld [vmem:[#allocation2 + $0x40] sm:$0xff]  ;;  %v250_v12 = vld [vmem:[#allocation2 + $0x38] sm:$0xff]  ;;  %s829_s27 = sshll.u32 %s215_s23, 3  ;;  %vm356_vm4 = vcmask 7168   ;;  %s505_s30 = sshll.u32 %s770_s19, 7 }
  0x28   : > { %s499_s10 = sshll.u32 %s817_s9, 3  ;;  %527 = vmatprep.subr.mxu0 %v720_v1  ;;  %v249_v13 = vld [vmem:[#allocation2 + $0x30] sm:$0xff]  ;;  %v248_v14 = vld [vmem:[#allocation2 + $0x28] sm:$0xff]  ;;  %v247_v15 = vld [vmem:[#allocation2 + $0x20] sm:$0xff]  ;;  %s217_s28 = scalar_lea.vmem [#allocation5], %s829_s27  ;;  %v353_v36 = vadd.s32 %v352_v34, %v351_v33 }
  0x29   : > { %s226_s13 = scalar_lea.vmem %s872_s0, %s499_s10  ;;  %s230_s22 = scalar_lea.vmem %s873_s1, %s499_s10  ;;  %528 = vmatpush3.msra.mxu0 %v257_v4  ;;  %v246_v16 = vld [vmem:[#allocation2 + $0x18] sm:$0xff]  ;;  %v245_v17 = vld [vmem:[#allocation2 + $0x10] sm:$0xff]  ;;  %v244_v18 = vld [vmem:[#allocation2 + $0x8] sm:$0xff] }
  0x2a   : > { %v236_v2 = vld [vmem:[%s226_s13] sm:$0xff]  ;;  %529 = vmatprep.subr.mxu0 %v720_v1  ;;  %vm354_vm3 = vcmp.lt.s32.totalorder %v353_v36, 16  ;;  %s387_s5 = sshll.u32 %s217_s28, 4  ;;  %s385_s8 = scalar_lea.hbm %s875_s3, %s505_s30  ;;  %s388_s5 = int_to_ptr.vmem [resolvable:$true] %s387_s5 }
  0x2b   : > { %238 = vperm.xlu0 %618, %v236_v2   ;;  %530 = vmatpush3.msra.mxu0 %v256_v5  ;;  %v340_v7 = vld [vmem:[%s230_s22] sm:$0xff]  ;;  %s371_s10 = scalar_lea.sflag [#allocation4], %s215_s23  ;;  %s650_s11 = scalar_lea.vmem %s388_s5, 128 }
  0x2c   : > { %531 = vmatprep.subr.mxu0 %v720_v1  ;;  %342 = vperm.xlu1 %619, %v340_v7   ;;  %v243_v19 = vld [vmem:[#allocation2] sm:$0xff]  ;;  %p651_p6 = scmp.ne.s32.totalorder %s388_s5, %s650_s11  ;;  %s723_s12 = smov [#allocation5]  }
  0x2d   : > { %532 = vmatpush3.msra.mxu0 %v255_v6  ;;  %s654_s13 = sshll.u32 %s723_s12, 4  ;;  %s655_s13 = int_to_ptr.vmem [resolvable:$false] %s654_s13 }
  0x2e   : > { %533 = vmatprep.subr.mxu0 %v720_v1  ;;  %p652_p9 = pnand %p651_p6, %p787_p5  ;;  %s656_s14 = scalar_lea.vmem %s655_s13, 256 }
  0x2f   : > { %534 = vmatpush3.msra.mxu0 %v254_v8  ;;  %p657_p11 = scmp.lt.s32.totalorder %s388_s5, %s655_s13  ;;  %p658_p12 = scmp.lt.s32.totalorder %s656_s14, %s650_s11 }
  0x30   : > { %535 = vmatprep.subr.mxu0 %v720_v1  ;;  %p653_p10 = pneg %p652_p9 }
  0x31   : > { %536 = vmatpush3.msra.mxu0 %v253_v9  ;;  %p659_p13 = por %p658_p12, %p657_p11 }
  0x32   : > { %537 = vmatprep.subr.mxu0 %v720_v1 }
  0x33   : > { %538 = vmatpush3.msra.mxu0 %v252_v10  ;;  %p660_p0 = pnand %p659_p13, %p653_p10 }
  0x34   : > { %539 = vmatprep.subr.mxu0 %v720_v1 }
  0x35   : > { %540 = vmatpush3.msra.mxu0 %v251_v11 }
  0x36   : > { %541 = vmatprep.subr.mxu0 %v720_v1 }
  0x37   : > { %542 = vmatpush3.msra.mxu0 %v250_v12 }
  0x38   : > { %543 = vmatprep.subr.mxu0 %v720_v1 }
  0x39   : > { %544 = vmatpush3.msra.mxu0 %v249_v13 }
  0x3a   : > { %545 = vmatprep.subr.mxu0 %v720_v1 }
  0x3b   : > { %546 = vmatpush3.msra.mxu0 %v248_v14 }
  0x3c   : > { %547 = vmatprep.subr.mxu0 %v720_v1 }
  0x3d   : > { %548 = vmatpush3.msra.mxu0 %v247_v15 }
  0x3e   : > { %549 = vmatprep.subr.mxu0 %v720_v1 }
  0x3f   : > { %550 = vmatpush3.msra.mxu0 %v246_v16 }
  0x40   : > { %551 = vmatprep.subr.mxu0 %v720_v1 }
  0x41   : > { %552 = vmatpush3.msra.mxu0 %v245_v17 }
  0x42   : > { %553 = vmatprep.subr.mxu0 %v720_v1 }
  0x43   : > { %554 = vmatpush3.msra.mxu0 %v244_v18 }
  0x44   : > { %555 = vmatprep.subr.mxu0 %v720_v1 }
  0x45   : > { %556 = vmatpush3.msra.mxu0 %v243_v19 }
  0xa6   : > { %v239_v22 = vpop.permute.xlu0 %238 }
  0xa7   : > { %vm240_vm1 = vcmp.eq.s32.totalorder %v239_v22, %v235_v21  ;;  %v343_v24 = vpop.permute.xlu1 %342 }
  0xa8   : > { %558 = vmatmul.mubr.msk.f32.vlgmr.msra.gmra.mxu0 %vm240_vm1, %v722_v23  ;;  %vm344_vm2 = vcmp.eq.s32.totalorder %v343_v24, %v235_v21 }
 0x168   : > { %v325_v25 = vpop.f32.mrf.mxu0 }
 0x169   : > { %330 = vmax.xlane.f32.xlu0 %v325_v25  ;;  %329 = vst [vmem:[%s217_s28] sm:$0xff] %v325_v25  ;;  %v345_v27 = vsel %vm344_vm2, %v325_v25, 0.0 }
 0x16a   : > { %v559_v26 = vpop.f32.mrf.mxu0 }
 0x16d   : > { %346 = vadd.xlane.f32.xlu0 %v345_v27 }
 0x1f2   : > { %v331_v28 = vpop.xlane.xlu0 %330 }
 0x1f3   : > { %v332_v29 = vsub.f32 %v325_v25, %v331_v28 }
 0x1f5   : > { %v333_v30 = vmul.f32 1.442695, %v332_v29 }
 0x1f6   : > { %v347_v39 = vpop.xlane.xlu0 %346 }
 0x1f7   : > { %620 = vpow2.f32 %v333_v30 }
 0x204   : > { %v621_v31 = vpop.eup %620 }
 0x205   : > { %335 = vadd.xlane.f32.xlu1 %v621_v31 }
 0x28e   : > { %v336_v32 = vpop.xlane.xlu1 %335 }
 0x28f   : > { %622 = vlog2.f32 %v336_v32 }
 0x29c   : > { %v623_v35 = vpop.eup %622 }
 0x29d   : > { %v338_v37 = vmul.f32 0.6931472, %v623_v35 }
 0x29f   : > { %v339_v38 = vadd.f32 %v338_v37, %v331_v28 }
 0x2a1   : > { %v348_v40 = vsub.f32 %v339_v38, %v347_v39 }
 0x2a3   : > { %v355_v41 = vsel %vm354_vm3, %v348_v40, 0.0 }
 0x2a4   : > { %v357_v42 = vsel %vm356_vm4, %v355_v41, 0.0 }
 0x2a5   : > { %358 = vadd.xlane.f32.xlu0 %v357_v42 }
 0x2a6   : > { %663 = shalt.err (!%p660_p0)
}
 0x2a7   : > { %s664_s19 = scalar_lea.hbm %s385_s8, 128  ;;  %s668_s23 = scalar_lea.hbm %s875_s3, 256 }
 0x2a8   : > { %p665_p1 = scmp.ne.s32.totalorder %s385_s8, %s664_s19  ;;  %p669_p4 = scmp.lt.s32.totalorder %s385_s8, %s875_s3 }
 0x2a9   : > { %p670_p7 = scmp.lt.s32.totalorder %s668_s23, %s664_s19 }
 0x2aa   : > { %p666_p2 = pnand %p665_p1, %p787_p5 }
 0x2ab   : > { %p671_p8 = por %p670_p7, %p669_p4 }
 0x2ac   : > { %p667_p3 = pneg %p666_p2 }
 0x2ae   : > { %p672_p6 = pnand %p671_p8, %p667_p3 }
 0x2b0   : > { %675 = shalt.err (!%p672_p6)
}
 0x2b1   : > { %566 = dma.vmem_to_hbm [thread:$0]  (%p787_p5), %s388_s5, 128, %s385_s8, %s371_s10   ;;  %vm368_vm5 = vcmask 0  }
 0x2b2   : > { %s233_s6 = scalar_lea.vmem %s876_s4, %s817_s9 }
 0x32e   : > { %v359_v43 = vpop.xlane.xlu0 %358 }
 0x32f   : > { %v360_v44 = vrot.slane %v359_v43, 4 }
 0x331   : > { %v361_v45 = vadd.f32 %v360_v44, %v359_v43 }
 0x333   : > { %v362_v46 = vrot.slane %v361_v45, 2 }
 0x335   : > { %v363_v47 = vadd.f32 %v362_v46, %v361_v45 }
 0x337   : > { %v364_v48 = vrot.slane %v363_v47, 1 }
 0x339   : > { %v365_v49 = vadd.f32 %v364_v48, %v363_v47 }
 0x33b   : > { %560 = vpush %v365_v49 }
 0x36c   : > { %s561_s7 = spop %560 }
 0x36d   : > { %v367_v50 = vstv %s561_s7 }
 0x36e   : > { %369 = vst.msk [vmem:[%s233_s6] sm:$0x1] %vm368_vm5, %v367_v50 }
 0x36f PF: > { %p578_p5 = scmp.ge.s32.totalorder %s714_s18, 2  ;;  %s402_s25 = sand.u32 1, %s702_s15  }
 0x370   : > { %p880_p9 = scmp.ne.s32.totalorder %s878_s26, 0  ;;  %s403_s5 = scalar_lea.sflag [#allocation4], %s402_s25 }
 0x372   : > { %p573_p10 = pnand %p578_p5, %p880_p9 }
 0x374   : > { %p574_p11 = pneg %p573_p10 }
 0x376   : > { %697 = dma.done.wait (%p574_p11), %s403_s5, 128  }
 0x377   : > { %699 = vsyncadd (%p574_p11), %s403_s5, 4294967168  ;;  %p16_p12 = scmp.ge.s32.totalorder %s774_s21, 4   ;;  %s881_s15 = smov %s706_s16 }
 0x378   : > { %s882_s16 = smov %s710_s17  ;;  %s883_s17 = smov %s785_s24 }
 0x379   : > { %s884_s18 = smov %s774_s21  ;;  %18 = sbr.rel (!%p16_p12) target bundleno = 4 (0x4), region = 87 }
 0x37e   :  { %414 = vsyncpa [#allocation3], 1 }
 0x37f   :  { %416 = vsyncpa [#allocation3 + $0x1], 1 }
 0x380   :  { %417 = vsyncpa [#allocation4], 1 }
 0x381   :  { %419 = vsyncpa [#allocation4 + $0x1], 1 }

</bundles_post_ra>
